<compile_context>
chip_gen: v5e
topology: v5e:2x2
jax: 0.10.0
libtpu: 0.0.40
codegen_flags: <defaults>
</compile_context>

<pallas_src>
import functools
import math

import jax
import jax.numpy as jnp
from jax.experimental import pallas as pl
from jax.experimental.pallas import tpu as pltpu

# Above v5e's 16 MiB default scoped VMEM, below v7x's 64 MiB physical VMEM.
_VMEM_LIMIT_BYTES = 40 * 1024 * 1024


def _round_up(x: int, m: int) -> int:
    return ((x + m - 1) // m) * m


def _transform_kernel(x_ref, dw_ref, db_ref, g_ref, b_ref, h_ref, *, eps):
    """dense -> exact (erf) GELU -> LayerNorm for one row tile.

    x_ref : (TM, H) input rows (native dtype)
    dw_ref: (H, H)  dense weight, torch (out, in) layout, resident across the grid
    db_ref: (1, H)  dense bias
    g_ref : (1, H)  LayerNorm gamma
    b_ref : (1, H)  LayerNorm beta
    h_ref : (TM, H) transformed hidden (dtype chosen by the wrapper)
    """
    # x @ Wd.T : contract the last dims of both operands (no transpose materialized),
    # native operand dtypes, f32 accumulation on the MXU.
    y = jax.lax.dot_general(
        x_ref[...], dw_ref[...],
        dimension_numbers=(((1,), (1,)), ((), ())),
        preferred_element_type=jnp.float32)
    y = y + db_ref[...].astype(jnp.float32)
    # exact (erf-based) GELU, as in the PyTorch reference
    y = y * 0.5 * (1.0 + jax.lax.erf(y * (1.0 / math.sqrt(2.0))))
    # LayerNorm over the hidden dim, all in f32
    mean = jnp.mean(y, axis=-1, keepdims=True)
    var = jnp.mean(jnp.square(y - mean), axis=-1, keepdims=True)
    y = (y - mean) * jax.lax.rsqrt(var + eps)
    y = y * g_ref[...].astype(jnp.float32) + b_ref[...].astype(jnp.float32)
    h_ref[...] = y.astype(h_ref.dtype)


def _decoder_kernel(h_ref, decw_ref, vb_ref, out_ref):
    """logits tile = h_tile @ dec_w_tile.T + bias_tile.

    h_ref   : (TM, H)  transformed hidden rows
    decw_ref: (TV, H)  decoder weight tile, torch (V, H) layout.  Because the row
                       axis is the innermost grid axis, this tile is fetched from
                       HBM once per vocab tile and reused across all row tiles.
    vb_ref  : (1, TV)  MLM output bias tile
    out_ref : (TM, TV) logits tile (lane-dense)
    """
    logits = jax.lax.dot_general(
        h_ref[...], decw_ref[...],
        dimension_numbers=(((1,), (1,)), ((), ())),
        preferred_element_type=jnp.float32)
    out_ref[...] = (logits + vb_ref[...].astype(jnp.float32)).astype(out_ref.dtype)


def mlm_head_forward(hidden_states, dense_w, dense_b, ln_gamma, ln_beta,
                     dec_w, mlm_bias, *, layer_norm_eps=1e-12,
                     dec_compute_dtype=None):
    """MLMHead forward.

    hidden_states: (..., H); dense_w: (H, H); dec_w: (V, H) (torch layouts).
    dec_compute_dtype: optional dtype (e.g. jnp.bfloat16) for the decoder weight
      stream and the transformed hidden `h`; accumulation stays f32.
    """
    *lead, H = hidden_states.shape
    V = dec_w.shape[0]

    x2d = hidden_states.reshape(-1, H)   # free reshape
    N = x2d.shape[0]

    # One-time HBM-side dtype harmonization; no upcasts inside the kernels.
    if dense_w.dtype != x2d.dtype:
        dense_w = dense_w.astype(x2d.dtype)
    if dec_compute_dtype is None:
        dec_compute_dtype = dec_w.dtype
    dec_compute_dtype = jnp.dtype(dec_compute_dtype)
    if dec_w.dtype != dec_compute_dtype:
        dec_w = dec_w.astype(dec_compute_dtype)

    # Pad rows to a sublane multiple so every row block is (8k, H)-aligned (cheap:
    # N*H bytes, negligible vs the V*H decoder stream).
    n_pad = _round_up(max(N, 1), 8)
    if n_pad != N:
        x2d = jnp.pad(x2d, ((0, n_pad - N), (0, 0)))

    # ---- fixed, lane-dense tiles; pl.cdiv grids handle partial final blocks ----
    tm = min(256, n_pad)
    dec_itemsize = dec_compute_dtype.itemsize
    if V >= 128:
        tv = 128
        for cand in (2048, 1024, 512, 256):
            # keep the double-buffered decoder-weight tile <= 8 MiB of VMEM
            if cand <= V and 2 * cand * H * dec_itemsize <= 8 * 1024 * 1024:
                tv = cand
                break
    else:
        tv = V   # tiny vocab: full-dim block is always legal

    num_row_tiles = pl.cdiv(n_pad, tm)
    num_vocab_tiles = pl.cdiv(V, tv)

    db2 = dense_b.reshape(1, H)
    g2 = ln_gamma.reshape(1, H)
    b2 = ln_beta.reshape(1, H)
    vb2 = mlm_bias.reshape(1, V)

    x_size = jnp.dtype(x2d.dtype).itemsize
    h_size = dec_itemsize
    out_dtype = hidden_states.dtype
    out_size = jnp.dtype(out_dtype).itemsize

    # ---- stage 1: PredictionHeadTransform (dense + gelu + layernorm) ----
    transform_cost = pl.CostEstimate(
        flops=int(2 * n_pad * H * H + 10 * n_pad * H),
        transcendentals=int(n_pad * H),
        bytes_accessed=int(n_pad * H * (x_size + h_size) + H * H * x_size + 3 * H * 4),
    )
    h2d = pl.pallas_call(
        functools.partial(_transform_kernel, eps=float(layer_norm_eps)),
        out_shape=jax.ShapeDtypeStruct((n_pad, H), dec_compute_dtype),
        grid=(num_row_tiles,),
        in_specs=[
            pl.BlockSpec((tm, H), lambda i: (i, 0)),   # x rows
            pl.BlockSpec((H, H), lambda i: (0, 0)),    # dense weight (resident)
            pl.BlockSpec((1, H), lambda i: (0, 0)),    # dense bias
            pl.BlockSpec((1, H), lambda i: (0, 0)),    # LN gamma
            pl.BlockSpec((1, H), lambda i: (0, 0)),    # LN beta
        ],
        out_specs=pl.BlockSpec((tm, H), lambda i: (i, 0)),
        compiler_params=pltpu.CompilerParams(
            dimension_semantics=("parallel",),
            vmem_limit_bytes=_VMEM_LIMIT_BYTES),
        cost_estimate=transform_cost,
    )(x2d, dense_w, db2, g2, b2)

    # ---- stage 2: decoder (vocab OUTER, rows INNER -> dec_w streamed once) ----
    decoder_cost = pl.CostEstimate(
        flops=int(2 * n_pad * V * H),
        transcendentals=0,
        bytes_accessed=int(V * H * dec_itemsize                 # weight: once
                           + num_vocab_tiles * n_pad * H * h_size  # h: per vocab tile
                           + n_pad * V * out_size + V * 4),
    )
    out2d = pl.pallas_call(
        _decoder_kernel,
        out_shape=jax.ShapeDtypeStruct((n_pad, V), out_dtype),
        grid=(num_vocab_tiles, num_row_tiles),
        in_specs=[
            pl.BlockSpec((tm, H), lambda j, i: (i, 0)),   # h rows (small re-stream)
            pl.BlockSpec((tv, H), lambda j, i: (j, 0)),   # decoder weight tile
            pl.BlockSpec((1, tv), lambda j, i: (0, j)),   # MLM bias tile
        ],
        out_specs=pl.BlockSpec((tm, tv), lambda j, i: (i, j)),
        compiler_params=pltpu.CompilerParams(
            # both axes independent: vocab splits across TensorCores even when
            # there is only one row tile (small-N inference on v7x).
            dimension_semantics=("parallel", "parallel"),
            vmem_limit_bytes=_VMEM_LIMIT_BYTES),
        cost_estimate=decoder_cost,
    )(h2d, dec_w, vb2)

    if n_pad != N:
        out2d = out2d[:N]
    return out2d.reshape(*lead, V)


if __name__ == "__main__":
    # Awkward small shapes on purpose: N = 2*5 = 10 rows (padded to 16) and V = 1000
    # (partial final vocab tile) to exercise the cdiv / padding paths.
    B, S, H, V = 2, 5, 32, 1000

    key = jax.random.PRNGKey(0)
    ks = jax.random.split(key, 7)

    hidden_states = jax.random.normal(ks[0], (B, S, H), dtype=jnp.float32)

    bound = 1.0 / math.sqrt(H)
    dense_w = jax.random.uniform(ks[1], (H, H), minval=-bound, maxval=bound,
                                 dtype=jnp.float32)            # (H_out, H_in)
    dense_b = jax.random.uniform(ks[2], (H,), minval=-bound, maxval=bound,
                                 dtype=jnp.float32)
    ln_gamma = 1.0 + 0.1 * jax.random.normal(ks[3], (H,), dtype=jnp.float32)
    ln_beta = 0.1 * jax.random.normal(ks[4], (H,), dtype=jnp.float32)
    dec_w = jax.random.uniform(ks[5], (V, H), minval=-bound, maxval=bound,
                               dtype=jnp.float32)              # (V, H)
    mlm_bias = 0.1 * jax.random.normal(ks[6], (V,), dtype=jnp.float32)

    # ---- plain-JAX reference (high-precision dots) ----
    eps = 1e-12
    x2d = hidden_states.reshape(-1, H)
    hp = jnp.dot(x2d, dense_w.T, precision=jax.lax.Precision.HIGHEST) + dense_b
    hp = hp * 0.5 * (1.0 + jax.lax.erf(hp / math.sqrt(2.0)))
    mu = jnp.mean(hp, axis=-1, keepdims=True)
    var = jnp.mean(jnp.square(hp - mu), axis=-1, keepdims=True)
    hp = (hp - mu) * jax.lax.rsqrt(var + eps) * ln_gamma + ln_beta
    ref = jnp.dot(hp, dec_w.T, precision=jax.lax.Precision.HIGHEST) + mlm_bias
    ref = ref.reshape(B, S, V)

    # ---- run 1: native f32 weights ----
    out = mlm_head_forward(hidden_states, dense_w, dense_b, ln_gamma, ln_beta,
                           dec_w, mlm_bias)
    out = jax.block_until_ready(out)
    assert out.shape == (B, S, V)
    assert jnp.allclose(out, ref, atol=5e-3, rtol=5e-3), \
        float(jnp.max(jnp.abs(out - ref)))

    # ---- run 2: bf16 decoder stream (halves dominant HBM traffic, f32 accum) ----
    out_bf16 = mlm_head_forward(hidden_states, dense_w, dense_b, ln_gamma, ln_beta,
                                dec_w, mlm_bias, dec_compute_dtype=jnp.bfloat16)
    out_bf16 = jax.block_until_ready(out_bf16)
    assert out_bf16.shape == (B, S, V)
    assert jnp.allclose(out_bf16, ref, atol=8e-2, rtol=8e-2), \
        float(jnp.max(jnp.abs(out_bf16 - ref)))

    print("KERNEL_OK")
</pallas_src>

<mosaic_0001>
module attributes {stable_mosaic.version = 11 : i64} {
  func.func @_transform_kernel(%arg0: i32, %arg1: memref<16x32xf32, #tpu.memory_space<vmem>>, %arg2: memref<32x32xf32, #tpu.memory_space<vmem>>, %arg3: memref<1x32xf32, #tpu.memory_space<vmem>>, %arg4: memref<1x32xf32, #tpu.memory_space<vmem>>, %arg5: memref<1x32xf32, #tpu.memory_space<vmem>>, %arg6: memref<16x32xf32, #tpu.memory_space<vmem>>) attributes {dimension_semantics = [#tpu.dimension_semantics<parallel>], iteration_bounds = array<i64: 1>, scalar_prefetch = 0 : i64, scratch_operands = 0 : i64, tpu.core_type = #tpu.core_type<tc>, window_params = [{transform_indices = @transform_0, window_bounds = array<i64: 16, 32>}, {pipeline_mode = #tpu.pipeline_mode<synchronous>, transform_indices = @transform_1, window_bounds = array<i64: 32, 32>}, {pipeline_mode = #tpu.pipeline_mode<synchronous>, transform_indices = @transform_2, window_bounds = array<i64: 1, 32>}, {pipeline_mode = #tpu.pipeline_mode<synchronous>, transform_indices = @transform_3, window_bounds = array<i64: 1, 32>}, {pipeline_mode = #tpu.pipeline_mode<synchronous>, transform_indices = @transform_4, window_bounds = array<i64: 1, 32>}, {transform_indices = @transform_5, window_bounds = array<i64: 16, 32>}]} {
    %c0 = arith.constant 0 : index
    %c0_0 = arith.constant 0 : index
    %0 = vector.load %arg1[%c0, %c0_0] : memref<16x32xf32, #tpu.memory_space<vmem>>, vector<16x32xf32>
    %c0_1 = arith.constant 0 : index
    %c0_2 = arith.constant 0 : index
    %1 = vector.load %arg2[%c0_1, %c0_2] : memref<32x32xf32, #tpu.memory_space<vmem>>, vector<32x32xf32>
    %cst = arith.constant dense<0.000000e+00> : vector<16x32xf32>
    %2 = tpu.matmul %0, %1, %cst {dimension_numbers = #tpu.dot_dimension_numbers<[1], [1], [0], [0], [0, 0, 1, 0], [], []>} : vector<16x32xf32>, vector<32x32xf32>, vector<16x32xf32> -> vector<16x32xf32>
    %c0_3 = arith.constant 0 : index
    %c0_4 = arith.constant 0 : index
    %3 = vector.load %arg3[%c0_3, %c0_4] : memref<1x32xf32, #tpu.memory_space<vmem>>, vector<1x32xf32>
    %4 = vector.broadcast %3 : vector<1x32xf32> to vector<16x32xf32>
    %5 = arith.addf %2, %4 : vector<16x32xf32>
    %cst_5 = arith.constant 5.000000e-01 : f32
    %6 = vector.broadcast %cst_5 : f32 to vector<16x32xf32>
    %7 = arith.mulf %5, %6 : vector<16x32xf32>
    %cst_6 = arith.constant 0.707106769 : f32
    %8 = vector.broadcast %cst_6 : f32 to vector<16x32xf32>
    %9 = arith.mulf %5, %8 : vector<16x32xf32>
    %10 = math.erf %9 : vector<16x32xf32>
    %cst_7 = arith.constant 1.000000e+00 : f32
    %11 = vector.broadcast %cst_7 : f32 to vector<16x32xf32>
    %12 = arith.addf %11, %10 : vector<16x32xf32>
    %13 = arith.mulf %7, %12 : vector<16x32xf32>
    %cst_8 = arith.constant dense<0.000000e+00> : vector<16xf32>
    %14 = vector.multi_reduction <add>, %13, %cst_8 [1] : vector<16x32xf32> to vector<16xf32>
    %15 = vector.shape_cast %14 : vector<16xf32> to vector<16x1xf32>
    %cst_9 = arith.constant 3.200000e+01 : f32
    %16 = vector.broadcast %cst_9 : f32 to vector<16x1xf32>
    %17 = arith.divf %15, %16 : vector<16x1xf32>
    %18 = vector.broadcast %17 : vector<16x1xf32> to vector<16x32xf32>
    %19 = arith.subf %13, %18 : vector<16x32xf32>
    %20 = arith.mulf %19, %19 : vector<16x32xf32>
    %cst_10 = arith.constant dense<0.000000e+00> : vector<16xf32>
    %21 = vector.multi_reduction <add>, %20, %cst_10 [1] : vector<16x32xf32> to vector<16xf32>
    %22 = vector.shape_cast %21 : vector<16xf32> to vector<16x1xf32>
    %cst_11 = arith.constant 3.200000e+01 : f32
    %23 = vector.broadcast %cst_11 : f32 to vector<16x1xf32>
    %24 = arith.divf %22, %23 : vector<16x1xf32>
    %25 = vector.broadcast %17 : vector<16x1xf32> to vector<16x32xf32>
    %26 = arith.subf %13, %25 : vector<16x32xf32>
    %cst_12 = arith.constant 9.99999996E-13 : f32
    %27 = vector.broadcast %cst_12 : f32 to vector<16x1xf32>
    %28 = arith.addf %24, %27 : vector<16x1xf32>
    %29 = math.rsqrt %28 : vector<16x1xf32>
    %30 = vector.broadcast %29 : vector<16x1xf32> to vector<16x32xf32>
    %31 = arith.mulf %26, %30 : vector<16x32xf32>
    %c0_13 = arith.constant 0 : index
    %c0_14 = arith.constant 0 : index
    %32 = vector.load %arg4[%c0_13, %c0_14] : memref<1x32xf32, #tpu.memory_space<vmem>>, vector<1x32xf32>
    %33 = vector.broadcast %32 : vector<1x32xf32> to vector<16x32xf32>
    %34 = arith.mulf %31, %33 : vector<16x32xf32>
    %c0_15 = arith.constant 0 : index
    %c0_16 = arith.constant 0 : index
    %35 = vector.load %arg5[%c0_15, %c0_16] : memref<1x32xf32, #tpu.memory_space<vmem>>, vector<1x32xf32>
    %36 = vector.broadcast %35 : vector<1x32xf32> to vector<16x32xf32>
    %37 = arith.addf %34, %36 : vector<16x32xf32>
    %c0_17 = arith.constant 0 : index
    %c0_18 = arith.constant 0 : index
    %38 = vector.load %arg6[%c0_17, %c0_18] : memref<16x32xf32, #tpu.memory_space<vmem>>, vector<16x32xf32>
    tpu.vector_store %arg6[%c0_17, %c0_18], %37 {strides = array<i32>} : memref<16x32xf32, #tpu.memory_space<vmem>>, vector<16x32xf32>,
    return
  }
  func.func @transform_0(%arg0: i32) -> (i32, i32) {
    %c0_i32 = arith.constant 0 : i32
    %c0_i32_0 = arith.constant 0 : i32
    return %arg0, %c0_i32 : i32, i32
  }
  func.func @transform_1(%arg0: i32) -> (i32, i32) {
    %c0_i32 = arith.constant 0 : i32
    %c0_i32_0 = arith.constant 0 : i32
    %c0_i32_1 = arith.constant 0 : i32
    return %c0_i32, %c0_i32_0 : i32, i32
  }
  func.func @transform_2(%arg0: i32) -> (i32, i32) {
    %c0_i32 = arith.constant 0 : i32
    %c0_i32_0 = arith.constant 0 : i32
    %c0_i32_1 = arith.constant 0 : i32
    return %c0_i32, %c0_i32_0 : i32, i32
  }
  func.func @transform_3(%arg0: i32) -> (i32, i32) {
    %c0_i32 = arith.constant 0 : i32
    %c0_i32_0 = arith.constant 0 : i32
    %c0_i32_1 = arith.constant 0 : i32
    return %c0_i32, %c0_i32_0 : i32, i32
  }
  func.func @transform_4(%arg0: i32) -> (i32, i32) {
    %c0_i32 = arith.constant 0 : i32
    %c0_i32_0 = arith.constant 0 : i32
    %c0_i32_1 = arith.constant 0 : i32
    return %c0_i32, %c0_i32_0 : i32, i32
  }
  func.func @transform_5(%arg0: i32) -> (i32, i32) {
    %c0_i32 = arith.constant 0 : i32
    %c0_i32_0 = arith.constant 0 : i32
    return %arg0, %c0_i32 : i32, i32
  }
}

</mosaic_0001>

<bundles_post_ra>
// kernel: tpu_custom_call.1
= control target key start
LH: loop header
LB: loop body
LE: loop exit
PB: predicated region body
PF: predicated region fallthrough
CT: control target
= control target key end

     0   :  { %10 = vsyncpa [#allocation3], 0  ;;  %s484_s0 = inlined_call_operand.hbm [shape: f32[16,32], index: 0, kind: input, shape index: {}]   ;;  %s485_s1 = inlined_call_operand.hbm [shape: f32[32,32], index: 1, kind: input, shape index: {}]   ;;  %s486_s2 = inlined_call_operand.vmem [shape: f32[1,32], index: 2, kind: input, shape index: {}]   ;;  %s487_s3 = inlined_call_operand.vmem [shape: f32[1,32], index: 3, kind: input, shape index: {}]   ;;  %s488_s4 = inlined_call_operand.vmem [shape: f32[1,32], index: 4, kind: input, shape index: {}]   ;;  %s489_s5 = inlined_call_operand.hbm [shape: f32[16,32], index: 5, kind: output, shape index: {}]  }
   0x1   :  { %11 = vsyncpa [#allocation6], 0 }
   0x2   :  { %12 = vsyncpa [#allocation4], 0  ;;  %s17_s20 = sshll.u32 %s484_s0, 4  ;;  %s387_s21 = smov [#allocation2]   ;;  %s18_s20 = int_to_ptr.hbm [resolvable:$true] %s17_s20 }
   0x3   :  { %s19_s22 = sshll.u32 %s387_s21, 4  ;;  %s30_s25 = sshll.u32 %s485_s1, 4  ;;  %s20_s22 = int_to_ptr.vmem [resolvable:$true] %s19_s22  ;;  %s31_s25 = int_to_ptr.hbm [resolvable:$true] %s30_s25 }
   0x4   :  { %s388_s26 = smov 128   ;;  %s389_s27 = smov 8  }
   0x5   :  { %25 = dma.hbm_to_vmem [thread:$0]  %s18_s20, 256, %s20_s22, [#allocation3], %s388_s26, %s388_s26, %s389_s27  }
   0x6   :  { %s390_s28 = smov [#allocation5]  }
   0x7   :  { %s32_s29 = sshll.u32 %s390_s28, 4  ;;  %s33_s29 = int_to_ptr.vmem [resolvable:$true] %s32_s29 }
   0x8   :  { %38 = dma.hbm_to_vmem [thread:$0]  %s31_s25, 512, %s33_s29, [#allocation6], %s388_s26, %s388_s26, %s389_s27  }
   0x9   :  { %381 = dma.done.wait [#allocation3], 256  }
   0xa   :  { %382 = vsyncadd [#allocation3], 4294967040 }
   0xb   :  { %383 = dma.done.wait [#allocation6], 512  }
   0xc   :  { %384 = vsyncadd [#allocation6], 4294966784  ;;  %vm63_vm0 = vcmask 261120   ;;  %v58_v0 = vld [vmem:[#allocation5 + $0x18] sm:$0xff]  ;;  %v57_v1 = vld [vmem:[#allocation5 + $0x10] sm:$0xff]  ;;  %s264_s11 = sshll.u32 %s489_s5, 4  ;;  %s265_s11 = int_to_ptr.hbm [resolvable:$true] %s264_s11 }
   0xd   :  { %278 = vmatpush.xpose.msk.msra.mxu0 %vm63_vm0, %v58_v0  ;;  %286 = vmatpush.xpose.msk.msra.mxu1 %vm63_vm0, %v58_v0  ;;  %v56_v2 = vld [vmem:[#allocation5 + $0x8] sm:$0xff]  ;;  %v55_v3 = vld [vmem:[#allocation5] sm:$0xff]  ;;  %v53_v4 = vld [vmem:[#allocation2] sm:$0xff] }
   0xe   :  { %v54_v5 = vld [vmem:[#allocation2 + $0x8] sm:$0xff]  ;;  %v296_v6 = vld [vmem:[%s486_s2] ss:$0 sm:$0xff] }
  0x11   :  { %279 = vmatpush.xpose.msk.msra.mxu0 %vm63_vm0, %v57_v1  ;;  %287 = vmatpush.xpose.msk.msra.mxu1 %vm63_vm0, %v57_v1 }
  0x15   :  { %280 = vmatpush.xpose.msk.msra.mxu0 %vm63_vm0, %v56_v2  ;;  %288 = vmatpush.xpose.msk.msra.mxu1 %vm63_vm0, %v56_v2 }
  0x19   :  { %281 = vmatpush.xpose.msk.msra.mxu0 %vm63_vm0, %v55_v3  ;;  %289 = vmatpush.xpose.msk.msra.mxu1 %vm63_vm0, %v55_v3 }
  0x1c   :  { %282 = vmatmul.msk.f32.vlgmr.msra.gmra.mxu0 %vm63_vm0, %v53_v4  ;;  %283 = vmatmul.msk.f32.vlgmr.msra.gmra.mxu1 %vm63_vm0, %v54_v5 }
  0x99   :  { %v99_v7 = vpop.f32.mrf.mxu0  ;;  %v102_v8 = vpop.f32.mrf.mxu1 }
  0x9a   :  { %v448_v9 = vadd.f32 %v296_v6, %v99_v7  ;;  %v450_v10 = vadd.f32 %v296_v6, %v102_v8 }
  0x9c   :  { %v453_v11 = vmul.f32 0.70710677, %v448_v9  ;;  %v456_v12 = vmul.f32 0.70710677, %v450_v10 }
  0x9e   :  { %v109_v13 = vmul.f32 %v453_v11, %v453_v11  ;;  %v149_v14 = vmul.f32 %v456_v12, %v456_v12 }
  0xa0   :  { %v110_v15 = vmin.f32 %v109_v13, 16.0  ;;  %v150_v16 = vmin.f32 %v149_v14, 16.0 }
  0xa2   :  { %v111_v17 = vmul.f32 2.1237322e-06, %v110_v15  ;;  %v151_v18 = vmul.f32 2.1237322e-06, %v150_v16  ;;  %v122_v19 = vmul.f32 3.8918573e-05, %v110_v15 }
  0xa3   :  { %v162_v20 = vmul.f32 3.8918573e-05, %v150_v16 }
  0xa4   :  { %v112_v21 = vadd.f32 0.00028619796, %v111_v17  ;;  %v152_v22 = vadd.f32 0.00028619796, %v151_v18  ;;  %v123_v23 = vadd.f32 0.001143296, %v122_v19 }
  0xa5   :  { %v163_v24 = vadd.f32 0.001143296, %v162_v20 }
  0xa6   :  { %v113_v25 = vmul.f32 %v112_v21, %v110_v15  ;;  %v153_v26 = vmul.f32 %v152_v22, %v150_v16  ;;  %v124_v27 = vmul.f32 %v123_v23, %v110_v15  ;;  %v105_v22 = vmul.f32 0.5, %v448_v9 }
  0xa7   :  { %v164_v28 = vmul.f32 %v163_v24, %v150_v16 }
  0xa8   :  { %v114_v29 = vadd.f32 0.0036580483, %v113_v25  ;;  %v125_v30 = vadd.f32 0.014752088, %v124_v27  ;;  %v154_v32 = vadd.f32 0.0036580483, %v153_v26 }
  0xa9   :  { %v165_v31 = vadd.f32 0.014752088, %v164_v28  ;;  %v106_v27 = vmul.f32 0.5, %v450_v10 }
  0xaa   :  { %v126_v33 = vmul.f32 %v125_v30, %v110_v15  ;;  %v115_v35 = vmul.f32 %v114_v29, %v110_v15  ;;  %v155_v38 = vmul.f32 %v154_v32, %v150_v16  ;;  %v391_v29 = vmov 32.0  }
  0xab   :  { %v166_v34 = vmul.f32 %v165_v31, %v150_v16 }
  0xac   :  { %v127_v36 = vadd.f32 0.112945676, %v126_v33  ;;  %v116_v41 = vadd.f32 0.05243302, %v115_v35  ;;  %v156_v44 = vadd.f32 0.05243302, %v155_v38 }
  0xad   :  { %v167_v37 = vadd.f32 0.112945676, %v166_v34 }
  0xae   :  { %v128_v39 = vmul.f32 %v127_v36, %v110_v15  ;;  %v117_v47 = vmul.f32 %v116_v41, %v110_v15  ;;  %v157_v50 = vmul.f32 %v156_v44, %v150_v16 }
  0xaf   :  { %v168_v40 = vmul.f32 %v167_v37, %v150_v16 }
  0xb0   :  { %v129_v42 = vadd.f32 0.4994258, %v128_v39  ;;  %v118_v51 = vadd.f32 0.18741608, %v117_v47  ;;  %v158_v52 = vadd.f32 0.18741608, %v157_v50 }
  0xb1   :  { %v169_v43 = vadd.f32 0.4994258, %v168_v40 }
  0xb2   :  { %v130_v45 = vmul.f32 %v129_v42, %v110_v15  ;;  %v119_v54 = vmul.f32 %v118_v51, %v110_v15  ;;  %v159_v57 = vmul.f32 %v158_v52, %v150_v16 }
  0xb3   :  { %v170_v46 = vmul.f32 %v169_v43, %v150_v16 }
  0xb4   :  { %v131_v48 = vadd.f32 1.0, %v130_v45  ;;  %v120_v60 = vadd.f32 1.1283791, %v119_v54  ;;  %v160_v2 = vadd.f32 1.1283791, %v159_v57 }
  0xb5   :  { %v171_v49 = vadd.f32 1.0, %v170_v46 }
  0xb6   :  { %299 = vrcp.f32 %v131_v48  ;;  %v143_v61 = vand.u32 2147483648, %v131_v48  ;;  %v141_v0 = vand.u32 2147483647, %v131_v48  ;;  %vm137_vm3 = vweird.f32 %v131_v48 }
  0xb7   :  { %301 = vrcp.f32 %v171_v49  ;;  %v183_v1 = vand.u32 2147483648, %v171_v49  ;;  %v181_v4 = vand.u32 2147483647, %v171_v49  ;;  %vm177_vm5 = vweird.f32 %v171_v49 }
  0xb8   :  { %v144_v6 = vor.u32 1.1754944e-38, %v143_v61  ;;  %v121_v8 = vmul.f32 %v120_v60, %v453_v11  ;;  %vm142_vm6 = vcmp.eq.f32.partialorder %v141_v0, 8.507059e+37  ;;  %v161_v15 = vmul.f32 %v160_v2, %v456_v12 }
  0xb9   :  { %v184_v14 = vor.u32 1.1754944e-38, %v183_v1  ;;  %vm182_vm8 = vcmp.eq.f32.partialorder %v181_v4, 8.507059e+37  ;;  %303 = vrcp.f32 %v391_v29 }
  0xbc   :  { %v300_v53 = vpop.eup %299 }
  0xbd   :  { %v302_v55 = vpop.eup %301  ;;  %v133_v56 = vmul.f32 %v300_v53, %v131_v48  ;;  %vm138_vm1 = vweird.f32 %v300_v53 }
  0xbe   :  { %v173_v58 = vmul.f32 %v302_v55, %v171_v49  ;;  %vm178_vm2 = vweird.f32 %v302_v55  ;;  %vm139_vm4 = vmor %vm137_vm3, %vm138_vm1 }
  0xbf   :  { %v134_v59 = vsub.f32 1.0, %v133_v56  ;;  %vm179_vm7 = vmor %vm177_vm5, %vm178_vm2  ;;  %v304_v30 = vpop.eup %303 }
  0xc0   :  { %v174_v62 = vsub.f32 1.0, %v173_v58  ;;  %v200_v31 = vmul.f32 32.0, %v304_v30  ;;  %vm204_vm9 = vweird.f32 %v304_v30  ;;  %v297_v58 = vld [vmem:[%s487_s3] ss:$0 sm:$0xff]  ;;  %s392_s3 = smov [#allocation7]  }
  0xc1   :  { %v135_v63 = vmul.f32 %v300_v53, %v134_v59  ;;  %s262_s8 = sshll.u32 %s392_s3, 4  ;;  %s263_s8 = int_to_ptr.vmem [resolvable:$true] %s262_s8 }
  0xc2   :  { %v175_v3 = vmul.f32 %v302_v55, %v174_v62  ;;  %v201_v32 = vsub.f32 1.0, %v200_v31  ;;  %v298_v62 = vld [vmem:[%s488_s4] ss:$0 sm:$0xff] }
  0xc3   :  { %v136_v5 = vadd.f32 %v300_v53, %v135_v63 }
  0xc4   :  { %v176_v7 = vadd.f32 %v302_v55, %v175_v3  ;;  %v202_v33 = vmul.f32 %v304_v30, %v201_v32 }
  0xc5   :  { %v140_v13 = vsel %vm139_vm4, %v300_v53, %v136_v5 }
  0xc6   :  { %v145_v16 = vsel %vm142_vm6, %v144_v6, %v140_v13  ;;  %v180_v17 = vsel %vm179_vm7, %v302_v55, %v176_v7  ;;  %v203_v9 = vadd.f32 %v304_v30, %v202_v33 }
  0xc7   :  { %v146_v18 = vmul.f32 %v145_v16, %v121_v8  ;;  %v185_v19 = vsel %vm182_vm8, %v184_v14, %v180_v17 }
  0xc8   :  { %v186_v20 = vmul.f32 %v185_v19, %v161_v15  ;;  %v205_v34 = vsel %vm204_vm9, %v304_v30, %v203_v9 }
  0xc9   :  { %v284_v21 = vclamps-f32 %v146_v18, 1.0 }
  0xca   :  { %v285_v24 = vclamps-f32 %v186_v20, 1.0 }
  0xcb   :  { %v189_v23 = vadd.f32 1.0, %v284_v21 }
  0xcc   :  { %v190_v26 = vadd.f32 1.0, %v285_v24 }
  0xcd   :  { %v191_v25 = vmul.f32 %v189_v23, %v105_v22 }
  0xce   :  { %v192_v28 = vmul.f32 %v190_v26, %v106_v27 }
  0xcf   :  { %v193_v11 = vsel %vm63_vm0, %v191_v25, 0.0 }
  0xd0   :  { %194 = vadd.xlane.f32.xlu0 %v193_v11  ;;  %v196_v12 = vsel %vm63_vm0, %v192_v28, 0.0 }
  0xd8   :  { %197 = vadd.xlane.f32.xlu0 %v196_v12 }
 0x143   :  { %v195_v35 = vpop.xlane.xlu0 %194 }
 0x144   :  { %v206_v36 = vmul.f32 %v205_v34, %v195_v35 }
 0x146   :  { %v208_v37 = vsub.f32 %v191_v25, %v206_v36 }
 0x148   :  { %v210_v38 = vmul.f32 %v208_v37, %v208_v37 }
 0x14a   :  { %v212_v39 = vsel %vm63_vm0, %v210_v38, 0.0 }
 0x14b   :  { %213 = vadd.xlane.f32.xlu1 %v212_v39  ;;  %v198_v10 = vpop.xlane.xlu0 %197 }
 0x14c   :  { %v207_v40 = vmul.f32 %v205_v34, %v198_v10 }
 0x14e   :  { %v209_v41 = vsub.f32 %v192_v28, %v207_v40 }
 0x150   :  { %v211_v42 = vmul.f32 %v209_v41, %v209_v41 }
 0x152   :  { %v215_v43 = vsel %vm63_vm0, %v211_v42, 0.0 }
 0x153   :  { %216 = vadd.xlane.f32.xlu1 %v215_v43 }
 0x1be   :  { %v214_v44 = vpop.xlane.xlu1 %213 }
 0x1bf   :  { %v218_v45 = vmul.f32 %v214_v44, %v205_v34 }
 0x1c1   :  { %v220_v46 = vadd.f32 1e-12, %v218_v45 }
 0x1c3   :  { %305 = vrsqrt.f32 %v220_v46  ;;  %vm228_vm11 = vweird.f32 %v220_v46 }
 0x1c6   :  { %v217_v47 = vpop.xlane.xlu1 %216 }
 0x1c7   :  { %v219_v48 = vmul.f32 %v217_v47, %v205_v34 }
 0x1c9   :  { %v306_v49 = vpop.eup %305  ;;  %v221_v50 = vadd.f32 1e-12, %v219_v48 }
 0x1ca   :  { %v223_v51 = vmul.f32 %v306_v49, %v220_v46  ;;  %vm229_vm10 = vweird.f32 %v306_v49 }
 0x1cb   :  { %307 = vrsqrt.f32 %v221_v50  ;;  %vm230_vm12 = vmor %vm228_vm11, %vm229_vm10  ;;  %vm238_vm14 = vweird.f32 %v221_v50 }
 0x1cc   :  { %v224_v52 = vmul.f32 %v306_v49, %v223_v51 }
 0x1ce   :  { %v225_v53 = vmul.f32 0.5, %v224_v52 }
 0x1d0   :  { %v226_v54 = vsub.f32 1.5, %v225_v53 }
 0x1d1   :  { %v308_v55 = vpop.eup %307 }
 0x1d2   :  { %v227_v56 = vmul.f32 %v306_v49, %v226_v54  ;;  %v233_v57 = vmul.f32 %v308_v55, %v221_v50  ;;  %vm239_vm13 = vweird.f32 %v308_v55 }
 0x1d3   :  { %vm240_vm15 = vmor %vm238_vm14, %vm239_vm13 }
 0x1d4   :  { %v231_v59 = vsel %vm230_vm12, %v306_v49, %v227_v56  ;;  %v234_v60 = vmul.f32 %v308_v55, %v233_v57 }
 0x1d5   :  { %v242_v61 = vmul.f32 %v231_v59, %v208_v37 }
 0x1d6   :  { %v235_v63 = vmul.f32 0.5, %v234_v60 }
 0x1d7   :  { %v248_v0 = vmul.f32 %v297_v58, %v242_v61 }
 0x1d8   :  { %v236_v1 = vsub.f32 1.5, %v235_v63 }
 0x1d9   :  { %v254_v2 = vadd.f32 %v298_v62, %v248_v0 }
 0x1da   :  { %v237_v3 = vmul.f32 %v308_v55, %v236_v1 }
 0x1db   :  { %256 = vst.msk [vmem:[#allocation7] sm:$0xff] %vm63_vm0, %v254_v2 }
 0x1dc   :  { %v241_v4 = vsel %vm240_vm15, %v308_v55, %v237_v3 }
 0x1dd   :  { %v243_v5 = vmul.f32 %v241_v4, %v209_v41 }
 0x1df   :  { %v249_v6 = vmul.f32 %v297_v58, %v243_v5 }
 0x1e1   :  { %v255_v7 = vadd.f32 %v298_v62, %v249_v6 }
 0x1e3   :  { %257 = vst.msk [vmem:[#allocation7 + $0x8] sm:$0xff] %vm63_vm0, %v255_v7 }
 0x1e4   :  { %270 = dma.vmem_to_hbm [thread:$0]  %s263_s8, 256, %s265_s11, [#allocation4], %s388_s26, %s388_s26, %s389_s27  }
 0x1e5   :  { %385 = dma.done.wait [#allocation4], 256  }
 0x1e6   :  { %386 = vsyncadd [#allocation4], 4294967040 }
 0x1e7   :  { %275 = vsyncpa [#allocation3], 1 }
 0x1e8   :  { %276 = vsyncpa [#allocation6], 1 }
 0x1e9   :  { %277 = vsyncpa [#allocation4], 1 }

</bundles_post_ra>
